<compile_context>
chip_gen: v6e
topology: v6e:2x2x1
jax: 0.10.0
libtpu: 0.0.40
codegen_flags: <defaults>
</compile_context>

<pallas_src>
import functools

import jax
import jax.numpy as jnp
import numpy as np
from jax.experimental import pallas as pl
from jax.experimental.pallas import tpu as pltpu


def _round_up(x, m):
    return (x + m - 1) // m * m


def _dsconv_kernel(x_ref, wdw_ref, b1_ref, wpw_ref, b2_ref, o_ref, *,
                   base, Wp, HpWp, K, pad, NB, use_mxu):
    # x_ref  : (NB, Cin_p, L)      guard-banded, padded-flat activations
    # wdw_ref: (K*K, Cin_p, 1)     depthwise weights, BN1 scale folded in
    # b1_ref : (Cin_p, 1)          folded BN1 bias (f32)
    # wpw_ref: (Cout_p, Cin_p) bf16 [MXU path]  or  (Cin_p, Cout_p, 1) f32 [VPU path]
    # b2_ref : (Cout_p, 1)         folded BN2 bias (f32)
    # o_ref  : (NB, Cout_p, HpWp)  output in padded-flat coords (NCHW-ready)
    for b in range(NB):                      # static unroll over folded images
        # Depthwise KxK: K*K ref-sliced taps, broadcast MAC on the VPU.
        # Slicing the *ref* (not a preloaded value) keeps only ~one tap + acc
        # live in vregs; the 3 vld slots/cycle have plenty of headroom.
        acc = None
        for kh in range(K):
            for kw in range(K):
                start = base + (kh - pad) * Wp + (kw - pad)
                tap = x_ref[b, :, start:start + HpWp] * wdw_ref[kh * K + kw]
                acc = tap if acc is None else acc + tap
        # Folded BN1 bias + ReLU6 (f32 on the VPU).
        mid = jnp.clip(acc + b1_ref[...], 0.0, 6.0)          # (Cin_p, HpWp)

        if use_mxu:
            # Production channel counts: one MXU matmul, bf16 in / f32 acc,
            # output lane-dense on the flat spatial axis.
            out = jnp.dot(wpw_ref[...], mid.astype(jnp.bfloat16),
                          preferred_element_type=jnp.float32)
        else:
            # Tiny channel counts: Cin_p broadcast-MACs of (Cout_p, HpWp)
            # tiles on the VPU (an 8x8 weight would light up <1% of the MXU
            # and its push/drain latency would dominate).
            out = None
            for ci in range(mid.shape[0]):
                term = wpw_ref[ci] * mid[ci:ci + 1, :].astype(jnp.float32)
                out = term if out is None else out + term
        o_ref[b] = (out + b2_ref[...]).astype(o_ref.dtype)


def dsconv(x_nchw, w_dw, bn1, w_pw, bn2, *, eps=1e-5, act_dtype=jnp.float32):
    """DSConv forward (inference-mode BN folded).

    x_nchw: (N, Cin, H, W).  w_dw: (Cin, 1, K, K) depthwise OIHW.
    w_pw: (Cout, Cin, 1, 1) OIHW.  bn1/bn2: (gamma, beta, run_mean, run_var).
    act_dtype: dtype of the depthwise stage.  float32 is safe on every chip
      (v5e has no bf16 VPU); pass jnp.bfloat16 on v6e/v7x to halve activation
      HBM traffic on this memory-bound kernel.
    """
    N, Cin, H, W = x_nchw.shape
    Cout = w_pw.shape[0]
    K = w_dw.shape[2]
    pad = (K - 1) // 2

    # Pad channel counts to sublane multiples (8) so every vreg is fully used.
    Cin_p = _round_up(Cin, 8)
    Cout_p = _round_up(Cout, 8)

    Hp, Wp = H + 2 * pad, W + 2 * pad
    HpWp = Hp * Wp
    grow = pad + 1                     # guard rows: grow*Wp >= pad*Wp + pad
    L = (H + 2 * (pad + grow)) * Wp    # flat length incl. guard band
    base = grow * Wp                   # flat index of padded-frame (0, 0)

    # ---- glue: fold BN running stats into weights / biases (tiny tensors) ---
    def fold(bn):
        g, b, rm, rv = bn
        s = g / jnp.sqrt(rv + eps)
        return s, b - rm * s

    s1, b1 = fold(bn1)
    s2, b2 = fold(bn2)

    # Depthwise weights (Cin,1,K,K) -> (K*K, Cin_p, 1), BN1 scale folded in.
    wdw = w_dw[:, 0, :, :] * s1[:, None, None]                   # (Cin, K, K)
    wdw = jnp.transpose(wdw, (1, 2, 0)).reshape(K * K, Cin)
    wdw = jnp.pad(wdw, ((0, 0), (0, Cin_p - Cin)))
    wdw = wdw.reshape(K * K, Cin_p, 1).astype(act_dtype)

    # Pointwise weights (Cout,Cin,1,1) -> BN2 scale folded; layout per path.
    wpw = w_pw[:, :, 0, 0] * s2[:, None]                         # (Cout, Cin)
    wpw = jnp.pad(wpw, ((0, Cout_p - Cout), (0, Cin_p - Cin)))
    use_mxu = Cin_p * Cout_p >= 1024
    if use_mxu:
        wpw_arg = wpw.astype(jnp.bfloat16)                       # (Cout_p, Cin_p)
        wpw_spec = pl.BlockSpec((Cout_p, Cin_p), lambda n: (0, 0))
    else:
        wpw_arg = jnp.transpose(wpw).reshape(Cin_p, Cout_p, 1).astype(jnp.float32)
        wpw_spec = pl.BlockSpec((Cin_p, Cout_p, 1), lambda n: (0, 0, 0))

    b1c = jnp.pad(b1, (0, Cin_p - Cin)).reshape(Cin_p, 1).astype(jnp.float32)
    b2c = jnp.pad(b2, (0, Cout_p - Cout)).reshape(Cout_p, 1).astype(jnp.float32)

    # ---- single fused pad: channel fill + spatial "same" pad + guard band ---
    x_ext = jnp.pad(x_nchw.astype(act_dtype),
                    ((0, 0), (0, Cin_p - Cin),
                     (pad + grow, pad + grow), (pad, pad)))
    x_ext = x_ext.reshape(N, Cin_p, L)            # contiguous -> free reshape

    # ---- fold NB images into each grid step ---------------------------------
    per_img = (Cin_p * L * np.dtype(act_dtype).itemsize
               + Cout_p * HpWp * x_nchw.dtype.itemsize)
    lane_target = 2048                 # per-step lane work target
    vmem_budget = 8 * 1024 * 1024      # per-step block budget; double-buffered
                                       # in+out blocks stay well under v7x's
                                       # 32 MiB scoped VMEM
    nb = max(1, min(N, pl.cdiv(lane_target, HpWp),
                    max(1, vmem_budget // per_img)))
    if N >= 8 and N // nb < 8:
        nb = max(1, N // 8)            # keep >= 8 grid steps for DMA overlap
    while N % nb:                      # keep the grid exact
        nb -= 1
    grid_n = N // nb

    kernel = functools.partial(_dsconv_kernel, base=base, Wp=Wp, HpWp=HpWp,
                               K=K, pad=pad, NB=nb, use_mxu=use_mxu)

    out_flat = pl.pallas_call(
        kernel,
        out_shape=jax.ShapeDtypeStruct((N, Cout_p, HpWp), x_nchw.dtype),
        grid_spec=pltpu.PrefetchScalarGridSpec(
            num_scalar_prefetch=0,
            grid=(grid_n,),
            in_specs=[
                pl.BlockSpec((nb, Cin_p, L), lambda n: (n, 0, 0)),
                pl.BlockSpec((K * K, Cin_p, 1), lambda n: (0, 0, 0)),
                pl.BlockSpec((Cin_p, 1), lambda n: (0, 0)),
                wpw_spec,
                pl.BlockSpec((Cout_p, 1), lambda n: (0, 0)),
            ],
            out_specs=pl.BlockSpec((nb, Cout_p, HpWp), lambda n: (n, 0, 0)),
        ),
        compiler_params=pltpu.CompilerParams(
            dimension_semantics=("parallel",),
            vmem_limit_bytes=32 * 1024 * 1024),
    )(x_ext, wdw, b1c, wpw_arg, b2c)

    # Valid outputs live at padded-flat index (h+pad)*Wp + (w+pad).  Border
    # positions of the padded frame wrap across rows and hold garbage by
    # construction; this slice removes them (and the padded output channels).
    out = out_flat.reshape(N, Cout_p, Hp, Wp)[:, :Cout, pad:pad + H, pad:pad + W]
    return out


def reference(x, w_dw, bn1, w_pw, bn2, eps=1e-5):
    """Pure-JAX reference matching PyTorch eval-mode DSConv."""
    dn = ('NCHW', 'OIHW', 'NCHW')
    C = x.shape[1]
    y = jax.lax.conv_general_dilated(x, w_dw, (1, 1), 'SAME',
                                     dimension_numbers=dn,
                                     feature_group_count=C)
    g1, be1, rm1, rv1 = bn1
    y = (y - rm1[None, :, None, None]) / jnp.sqrt(rv1[None, :, None, None] + eps)
    y = y * g1[None, :, None, None] + be1[None, :, None, None]
    y = jnp.clip(y, 0.0, 6.0)
    y = jax.lax.conv_general_dilated(y, w_pw, (1, 1), 'SAME',
                                     dimension_numbers=dn)
    g2, be2, rm2, rv2 = bn2
    y = (y - rm2[None, :, None, None]) / jnp.sqrt(rv2[None, :, None, None] + eps)
    y = y * g2[None, :, None, None] + be2[None, :, None, None]
    return y


def _make_inputs(key, N, Cin, Cout, H, W, K):
    keys = jax.random.split(key, 11)
    x = jax.random.normal(keys[0], (N, Cin, H, W), dtype=jnp.float32)
    w_dw = 0.1 * jax.random.normal(keys[1], (Cin, 1, K, K), dtype=jnp.float32)
    w_pw = 0.1 * jax.random.normal(keys[2], (Cout, Cin, 1, 1), dtype=jnp.float32)
    bn1 = (jax.random.uniform(keys[3], (Cin,), minval=0.5, maxval=1.5),
           0.1 * jax.random.normal(keys[4], (Cin,)),
           0.1 * jax.random.normal(keys[5], (Cin,)),
           jax.random.uniform(keys[6], (Cin,), minval=0.5, maxval=1.5))
    bn2 = (jax.random.uniform(keys[7], (Cout,), minval=0.5, maxval=1.5),
           0.1 * jax.random.normal(keys[8], (Cout,)),
           0.1 * jax.random.normal(keys[9], (Cout,)),
           jax.random.uniform(keys[10], (Cout,), minval=0.5, maxval=1.5))
    return x, w_dw, bn1, w_pw, bn2


if __name__ == "__main__":
    key = jax.random.PRNGKey(0)
    k1, k2 = jax.random.split(key)

    # DSConv(in_channels=4, out_channels=8, kernel_size=3, stride=1):
    # all-f32 path (VPU pointwise for the tiny 8x8 channel block), so the
    # reference check is tight (catches real bugs, unlike a 2e-2 tolerance).
    x, w_dw, bn1, w_pw, bn2 = _make_inputs(k1, N=2, Cin=4, Cout=8, H=16, W=16, K=3)
    out = jax.block_until_ready(dsconv(x, w_dw, bn1, w_pw, bn2))
    ref = jax.block_until_ready(reference(x, w_dw, bn1, w_pw, bn2))
    np.testing.assert_allclose(np.asarray(out), np.asarray(ref),
                               rtol=1e-3, atol=1e-4)

    # Wider-channel config exercising the MXU pointwise path and the bf16
    # depthwise path recommended for v6e/v7x (bf16 math -> looser tolerance).
    x2, w_dw2, bn1_2, w_pw2, bn2_2 = _make_inputs(
        k2, N=2, Cin=32, Cout=32, H=8, W=8, K=3)
    x2 = x2.astype(jnp.bfloat16).astype(jnp.float32)   # same quantized input
    out2 = jax.block_until_ready(
        dsconv(x2, w_dw2, bn1_2, w_pw2, bn2_2, act_dtype=jnp.bfloat16))
    ref2 = jax.block_until_ready(reference(x2, w_dw2, bn1_2, w_pw2, bn2_2))
    np.testing.assert_allclose(np.asarray(out2), np.asarray(ref2),
                               rtol=5e-2, atol=5e-2)

    print("KERNEL_OK")
</pallas_src>

<mosaic_0001>
module attributes {stable_mosaic.version = 11 : i64} {
  func.func @_dsconv_kernel(%arg0: i32, %arg1: memref<2x8x396xf32, #tpu.memory_space<vmem>>, %arg2: memref<9x8x1xf32, #tpu.memory_space<vmem>>, %arg3: memref<8x1xf32, #tpu.memory_space<vmem>>, %arg4: memref<8x8x1xf32, #tpu.memory_space<vmem>>, %arg5: memref<8x1xf32, #tpu.memory_space<vmem>>, %arg6: memref<2x8x324xf32, #tpu.memory_space<vmem>>) attributes {dimension_semantics = [#tpu.dimension_semantics<parallel>], iteration_bounds = array<i64: 1>, scalar_prefetch = 0 : i64, scratch_operands = 0 : i64, tpu.core_type = #tpu.core_type<tc>, window_params = [{transform_indices = @transform_0, window_bounds = array<i64: 2, 8, 396>}, {pipeline_mode = #tpu.pipeline_mode<synchronous>, transform_indices = @transform_1, window_bounds = array<i64: 9, 8, 1>}, {pipeline_mode = #tpu.pipeline_mode<synchronous>, transform_indices = @transform_2, window_bounds = array<i64: 8, 1>}, {pipeline_mode = #tpu.pipeline_mode<synchronous>, transform_indices = @transform_3, window_bounds = array<i64: 8, 8, 1>}, {pipeline_mode = #tpu.pipeline_mode<synchronous>, transform_indices = @transform_4, window_bounds = array<i64: 8, 1>}, {transform_indices = @transform_5, window_bounds = array<i64: 2, 8, 324>}]} {
    %c0 = arith.constant 0 : index
    %c0_0 = arith.constant 0 : index
    %c17 = arith.constant 17 : index
    %0 = vector.load %arg1[%c0, %c0_0, %c17] : memref<2x8x396xf32, #tpu.memory_space<vmem>>, vector<1x8x324xf32>
    %1 = vector.shape_cast %0 : vector<1x8x324xf32> to vector<8x324xf32>
    %c0_1 = arith.constant 0 : index
    %c0_2 = arith.constant 0 : index
    %c0_3 = arith.constant 0 : index
    %2 = vector.load %arg2[%c0_1, %c0_2, %c0_3] : memref<9x8x1xf32, #tpu.memory_space<vmem>>, vector<1x8x1xf32>
    %3 = vector.shape_cast %2 : vector<1x8x1xf32> to vector<8x1xf32>
    %4 = vector.broadcast %3 : vector<8x1xf32> to vector<8x324xf32>
    %5 = arith.mulf %1, %4 : vector<8x324xf32>
    %c0_4 = arith.constant 0 : index
    %c0_5 = arith.constant 0 : index
    %c18 = arith.constant 18 : index
    %6 = vector.load %arg1[%c0_4, %c0_5, %c18] : memref<2x8x396xf32, #tpu.memory_space<vmem>>, vector<1x8x324xf32>
    %7 = vector.shape_cast %6 : vector<1x8x324xf32> to vector<8x324xf32>
    %c1 = arith.constant 1 : index
    %c0_6 = arith.constant 0 : index
    %c0_7 = arith.constant 0 : index
    %8 = vector.load %arg2[%c1, %c0_6, %c0_7] : memref<9x8x1xf32, #tpu.memory_space<vmem>>, vector<1x8x1xf32>
    %9 = vector.shape_cast %8 : vector<1x8x1xf32> to vector<8x1xf32>
    %10 = vector.broadcast %9 : vector<8x1xf32> to vector<8x324xf32>
    %11 = arith.mulf %7, %10 : vector<8x324xf32>
    %12 = arith.addf %5, %11 : vector<8x324xf32>
    %c0_8 = arith.constant 0 : index
    %c0_9 = arith.constant 0 : index
    %c19 = arith.constant 19 : index
    %13 = vector.load %arg1[%c0_8, %c0_9, %c19] : memref<2x8x396xf32, #tpu.memory_space<vmem>>, vector<1x8x324xf32>
    %14 = vector.shape_cast %13 : vector<1x8x324xf32> to vector<8x324xf32>
    %c2 = arith.constant 2 : index
    %c0_10 = arith.constant 0 : index
    %c0_11 = arith.constant 0 : index
    %15 = vector.load %arg2[%c2, %c0_10, %c0_11] : memref<9x8x1xf32, #tpu.memory_space<vmem>>, vector<1x8x1xf32>
    %16 = vector.shape_cast %15 : vector<1x8x1xf32> to vector<8x1xf32>
    %17 = vector.broadcast %16 : vector<8x1xf32> to vector<8x324xf32>
    %18 = arith.mulf %14, %17 : vector<8x324xf32>
    %19 = arith.addf %12, %18 : vector<8x324xf32>
    %c0_12 = arith.constant 0 : index
    %c0_13 = arith.constant 0 : index
    %c35 = arith.constant 35 : index
    %20 = vector.load %arg1[%c0_12, %c0_13, %c35] : memref<2x8x396xf32, #tpu.memory_space<vmem>>, vector<1x8x324xf32>
    %21 = vector.shape_cast %20 : vector<1x8x324xf32> to vector<8x324xf32>
    %c3 = arith.constant 3 : index
    %c0_14 = arith.constant 0 : index
    %c0_15 = arith.constant 0 : index
    %22 = vector.load %arg2[%c3, %c0_14, %c0_15] : memref<9x8x1xf32, #tpu.memory_space<vmem>>, vector<1x8x1xf32>
    %23 = vector.shape_cast %22 : vector<1x8x1xf32> to vector<8x1xf32>
    %24 = vector.broadcast %23 : vector<8x1xf32> to vector<8x324xf32>
    %25 = arith.mulf %21, %24 : vector<8x324xf32>
    %26 = arith.addf %19, %25 : vector<8x324xf32>
    %c0_16 = arith.constant 0 : index
    %c0_17 = arith.constant 0 : index
    %c36 = arith.constant 36 : index
    %27 = vector.load %arg1[%c0_16, %c0_17, %c36] : memref<2x8x396xf32, #tpu.memory_space<vmem>>, vector<1x8x324xf32>
    %28 = vector.shape_cast %27 : vector<1x8x324xf32> to vector<8x324xf32>
    %c4 = arith.constant 4 : index
    %c0_18 = arith.constant 0 : index
    %c0_19 = arith.constant 0 : index
    %29 = vector.load %arg2[%c4, %c0_18, %c0_19] : memref<9x8x1xf32, #tpu.memory_space<vmem>>, vector<1x8x1xf32>
    %30 = vector.shape_cast %29 : vector<1x8x1xf32> to vector<8x1xf32>
    %31 = vector.broadcast %30 : vector<8x1xf32> to vector<8x324xf32>
    %32 = arith.mulf %28, %31 : vector<8x324xf32>
    %33 = arith.addf %26, %32 : vector<8x324xf32>
    %c0_20 = arith.constant 0 : index
    %c0_21 = arith.constant 0 : index
    %c37 = arith.constant 37 : index
    %34 = vector.load %arg1[%c0_20, %c0_21, %c37] : memref<2x8x396xf32, #tpu.memory_space<vmem>>, vector<1x8x324xf32>
    %35 = vector.shape_cast %34 : vector<1x8x324xf32> to vector<8x324xf32>
    %c5 = arith.constant 5 : index
    %c0_22 = arith.constant 0 : index
    %c0_23 = arith.constant 0 : index
    %36 = vector.load %arg2[%c5, %c0_22, %c0_23] : memref<9x8x1xf32, #tpu.memory_space<vmem>>, vector<1x8x1xf32>
    %37 = vector.shape_cast %36 : vector<1x8x1xf32> to vector<8x1xf32>
    %38 = vector.broadcast %37 : vector<8x1xf32> to vector<8x324xf32>
    %39 = arith.mulf %35, %38 : vector<8x324xf32>
    %40 = arith.addf %33, %39 : vector<8x324xf32>
    %c0_24 = arith.constant 0 : index
    %c0_25 = arith.constant 0 : index
    %c53 = arith.constant 53 : index
    %41 = vector.load %arg1[%c0_24, %c0_25, %c53] : memref<2x8x396xf32, #tpu.memory_space<vmem>>, vector<1x8x324xf32>
    %42 = vector.shape_cast %41 : vector<1x8x324xf32> to vector<8x324xf32>
    %c6 = arith.constant 6 : index
    %c0_26 = arith.constant 0 : index
    %c0_27 = arith.constant 0 : index
    %43 = vector.load %arg2[%c6, %c0_26, %c0_27] : memref<9x8x1xf32, #tpu.memory_space<vmem>>, vector<1x8x1xf32>
    %44 = vector.shape_cast %43 : vector<1x8x1xf32> to vector<8x1xf32>
    %45 = vector.broadcast %44 : vector<8x1xf32> to vector<8x324xf32>
    %46 = arith.mulf %42, %45 : vector<8x324xf32>
    %47 = arith.addf %40, %46 : vector<8x324xf32>
    %c0_28 = arith.constant 0 : index
    %c0_29 = arith.constant 0 : index
    %c54 = arith.constant 54 : index
    %48 = vector.load %arg1[%c0_28, %c0_29, %c54] : memref<2x8x396xf32, #tpu.memory_space<vmem>>, vector<1x8x324xf32>
    %49 = vector.shape_cast %48 : vector<1x8x324xf32> to vector<8x324xf32>
    %c7 = arith.constant 7 : index
    %c0_30 = arith.constant 0 : index
    %c0_31 = arith.constant 0 : index
    %50 = vector.load %arg2[%c7, %c0_30, %c0_31] : memref<9x8x1xf32, #tpu.memory_space<vmem>>, vector<1x8x1xf32>
    %51 = vector.shape_cast %50 : vector<1x8x1xf32> to vector<8x1xf32>
    %52 = vector.broadcast %51 : vector<8x1xf32> to vector<8x324xf32>
    %53 = arith.mulf %49, %52 : vector<8x324xf32>
    %54 = arith.addf %47, %53 : vector<8x324xf32>
    %c0_32 = arith.constant 0 : index
    %c0_33 = arith.constant 0 : index
    %c55 = arith.constant 55 : index
    %55 = vector.load %arg1[%c0_32, %c0_33, %c55] : memref<2x8x396xf32, #tpu.memory_space<vmem>>, vector<1x8x324xf32>
    %56 = vector.shape_cast %55 : vector<1x8x324xf32> to vector<8x324xf32>
    %c8 = arith.constant 8 : index
    %c0_34 = arith.constant 0 : index
    %c0_35 = arith.constant 0 : index
    %57 = vector.load %arg2[%c8, %c0_34, %c0_35] : memref<9x8x1xf32, #tpu.memory_space<vmem>>, vector<1x8x1xf32>
    %58 = vector.shape_cast %57 : vector<1x8x1xf32> to vector<8x1xf32>
    %59 = vector.broadcast %58 : vector<8x1xf32> to vector<8x324xf32>
    %60 = arith.mulf %56, %59 : vector<8x324xf32>
    %61 = arith.addf %54, %60 : vector<8x324xf32>
    %c0_36 = arith.constant 0 : index
    %c0_37 = arith.constant 0 : index
    %62 = vector.load %arg3[%c0_36, %c0_37] : memref<8x1xf32, #tpu.memory_space<vmem>>, vector<8x1xf32>
    %63 = vector.broadcast %62 : vector<8x1xf32> to vector<8x324xf32>
    %64 = arith.addf %61, %63 : vector<8x324xf32>
    %cst = arith.constant 0.000000e+00 : f32
    %cst_38 = arith.constant 6.000000e+00 : f32
    %65 = vector.broadcast %cst : f32 to vector<8x324xf32>
    %66 = arith.maximumf %65, %64 : vector<8x324xf32>
    %67 = vector.broadcast %cst_38 : f32 to vector<8x324xf32>
    %68 = arith.minimumf %67, %66 : vector<8x324xf32>
    %c0_39 = arith.constant 0 : index
    %c0_40 = arith.constant 0 : index
    %c0_41 = arith.constant 0 : index
    %69 = vector.load %arg4[%c0_39, %c0_40, %c0_41] : memref<8x8x1xf32, #tpu.memory_space<vmem>>, vector<1x8x1xf32>
    %70 = vector.shape_cast %69 : vector<1x8x1xf32> to vector<8x1xf32>
    %71 = vector.extract_strided_slice %68 {offsets = [0, 0], sizes = [1, 324], strides = [1, 1]} : vector<8x324xf32> to vector<1x324xf32>
    %72 = vector.broadcast %70 : vector<8x1xf32> to vector<8x324xf32>
    %73 = vector.broadcast %71 : vector<1x324xf32> to vector<8x324xf32>
    %74 = arith.mulf %72, %73 : vector<8x324xf32>
    %c1_42 = arith.constant 1 : index
    %c0_43 = arith.constant 0 : index
    %c0_44 = arith.constant 0 : index
    %75 = vector.load %arg4[%c1_42, %c0_43, %c0_44] : memref<8x8x1xf32, #tpu.memory_space<vmem>>, vector<1x8x1xf32>
    %76 = vector.shape_cast %75 : vector<1x8x1xf32> to vector<8x1xf32>
    %77 = vector.extract_strided_slice %68 {offsets = [1, 0], sizes = [1, 324], strides = [1, 1]} : vector<8x324xf32> to vector<1x324xf32>
    %78 = vector.broadcast %76 : vector<8x1xf32> to vector<8x324xf32>
    %79 = vector.broadcast %77 : vector<1x324xf32> to vector<8x324xf32>
    %80 = arith.mulf %78, %79 : vector<8x324xf32>
    %81 = arith.addf %74, %80 : vector<8x324xf32>
    %c2_45 = arith.constant 2 : index
    %c0_46 = arith.constant 0 : index
    %c0_47 = arith.constant 0 : index
    %82 = vector.load %arg4[%c2_45, %c0_46, %c0_47] : memref<8x8x1xf32, #tpu.memory_space<vmem>>, vector<1x8x1xf32>
    %83 = vector.shape_cast %82 : vector<1x8x1xf32> to vector<8x1xf32>
    %84 = vector.extract_strided_slice %68 {offsets = [2, 0], sizes = [1, 324], strides = [1, 1]} : vector<8x324xf32> to vector<1x324xf32>
    %85 = vector.broadcast %83 : vector<8x1xf32> to vector<8x324xf32>
    %86 = vector.broadcast %84 : vector<1x324xf32> to vector<8x324xf32>
    %87 = arith.mulf %85, %86 : vector<8x324xf32>
    %88 = arith.addf %81, %87 : vector<8x324xf32>
    %c3_48 = arith.constant 3 : index
    %c0_49 = arith.constant 0 : index
    %c0_50 = arith.constant 0 : index
    %89 = vector.load %arg4[%c3_48, %c0_49, %c0_50] : memref<8x8x1xf32, #tpu.memory_space<vmem>>, vector<1x8x1xf32>
    %90 = vector.shape_cast %89 : vector<1x8x1xf32> to vector<8x1xf32>
    %91 = vector.extract_strided_slice %68 {offsets = [3, 0], sizes = [1, 324], strides = [1, 1]} : vector<8x324xf32> to vector<1x324xf32>
    %92 = vector.broadcast %90 : vector<8x1xf32> to vector<8x324xf32>
    %93 = vector.broadcast %91 : vector<1x324xf32> to vector<8x324xf32>
    %94 = arith.mulf %92, %93 : vector<8x324xf32>
    %95 = arith.addf %88, %94 : vector<8x324xf32>
    %c4_51 = arith.constant 4 : index
    %c0_52 = arith.constant 0 : index
    %c0_53 = arith.constant 0 : index
    %96 = vector.load %arg4[%c4_51, %c0_52, %c0_53] : memref<8x8x1xf32, #tpu.memory_space<vmem>>, vector<1x8x1xf32>
    %97 = vector.shape_cast %96 : vector<1x8x1xf32> to vector<8x1xf32>
    %98 = vector.extract_strided_slice %68 {offsets = [4, 0], sizes = [1, 324], strides = [1, 1]} : vector<8x324xf32> to vector<1x324xf32>
    %99 = vector.broadcast %97 : vector<8x1xf32> to vector<8x324xf32>
    %100 = vector.broadcast %98 : vector<1x324xf32> to vector<8x324xf32>
    %101 = arith.mulf %99, %100 : vector<8x324xf32>
    %102 = arith.addf %95, %101 : vector<8x324xf32>
    %c5_54 = arith.constant 5 : index
    %c0_55 = arith.constant 0 : index
    %c0_56 = arith.constant 0 : index
    %103 = vector.load %arg4[%c5_54, %c0_55, %c0_56] : memref<8x8x1xf32, #tpu.memory_space<vmem>>, vector<1x8x1xf32>
    %104 = vector.shape_cast %103 : vector<1x8x1xf32> to vector<8x1xf32>
    %105 = vector.extract_strided_slice %68 {offsets = [5, 0], sizes = [1, 324], strides = [1, 1]} : vector<8x324xf32> to vector<1x324xf32>
    %106 = vector.broadcast %104 : vector<8x1xf32> to vector<8x324xf32>
    %107 = vector.broadcast %105 : vector<1x324xf32> to vector<8x324xf32>
    %108 = arith.mulf %106, %107 : vector<8x324xf32>
    %109 = arith.addf %102, %108 : vector<8x324xf32>
    %c6_57 = arith.constant 6 : index
    %c0_58 = arith.constant 0 : index
    %c0_59 = arith.constant 0 : index
    %110 = vector.load %arg4[%c6_57, %c0_58, %c0_59] : memref<8x8x1xf32, #tpu.memory_space<vmem>>, vector<1x8x1xf32>
    %111 = vector.shape_cast %110 : vector<1x8x1xf32> to vector<8x1xf32>
    %112 = vector.extract_strided_slice %68 {offsets = [6, 0], sizes = [1, 324], strides = [1, 1]} : vector<8x324xf32> to vector<1x324xf32>
    %113 = vector.broadcast %111 : vector<8x1xf32> to vector<8x324xf32>
    %114 = vector.broadcast %112 : vector<1x324xf32> to vector<8x324xf32>
    %115 = arith.mulf %113, %114 : vector<8x324xf32>
    %116 = arith.addf %109, %115 : vector<8x324xf32>
    %c7_60 = arith.constant 7 : index
    %c0_61 = arith.constant 0 : index
    %c0_62 = arith.constant 0 : index
    %117 = vector.load %arg4[%c7_60, %c0_61, %c0_62] : memref<8x8x1xf32, #tpu.memory_space<vmem>>, vector<1x8x1xf32>
    %118 = vector.shape_cast %117 : vector<1x8x1xf32> to vector<8x1xf32>
    %119 = vector.extract_strided_slice %68 {offsets = [7, 0], sizes = [1, 324], strides = [1, 1]} : vector<8x324xf32> to vector<1x324xf32>
    %120 = vector.broadcast %118 : vector<8x1xf32> to vector<8x324xf32>
    %121 = vector.broadcast %119 : vector<1x324xf32> to vector<8x324xf32>
    %122 = arith.mulf %120, %121 : vector<8x324xf32>
    %123 = arith.addf %116, %122 : vector<8x324xf32>
    %c0_63 = arith.constant 0 : index
    %c0_64 = arith.constant 0 : index
    %124 = vector.load %arg5[%c0_63, %c0_64] : memref<8x1xf32, #tpu.memory_space<vmem>>, vector<8x1xf32>
    %125 = vector.broadcast %124 : vector<8x1xf32> to vector<8x324xf32>
    %126 = arith.addf %123, %125 : vector<8x324xf32>
    %c0_65 = arith.constant 0 : index
    %c0_66 = arith.constant 0 : index
    %c0_67 = arith.constant 0 : index
    %127 = vector.load %arg6[%c0_65, %c0_66, %c0_67] : memref<2x8x324xf32, #tpu.memory_space<vmem>>, vector<1x8x324xf32>
    %128 = vector.shape_cast %127 : vector<1x8x324xf32> to vector<8x324xf32>
    %129 = vector.shape_cast %126 : vector<8x324xf32> to vector<1x8x324xf32>
    tpu.vector_store %arg6[%c0_65, %c0_66, %c0_67], %129 {strides = array<i32>} : memref<2x8x324xf32, #tpu.memory_space<vmem>>, vector<1x8x324xf32>,
    %c1_68 = arith.constant 1 : index
    %c0_69 = arith.constant 0 : index
    %c17_70 = arith.constant 17 : index
    %130 = vector.load %arg1[%c1_68, %c0_69, %c17_70] : memref<2x8x396xf32, #tpu.memory_space<vmem>>, vector<1x8x324xf32>
    %131 = vector.shape_cast %130 : vector<1x8x324xf32> to vector<8x324xf32>
    %c0_71 = arith.constant 0 : index
    %c0_72 = arith.constant 0 : index
    %c0_73 = arith.constant 0 : index
    %132 = vector.load %arg2[%c0_71, %c0_72, %c0_73] : memref<9x8x1xf32, #tpu.memory_space<vmem>>, vector<1x8x1xf32>
    %133 = vector.shape_cast %132 : vector<1x8x1xf32> to vector<8x1xf32>
    %134 = vector.broadcast %133 : vector<8x1xf32> to vector<8x324xf32>
    %135 = arith.mulf %131, %134 : vector<8x324xf32>
    %c1_74 = arith.constant 1 : index
    %c0_75 = arith.constant 0 : index
    %c18_76 = arith.constant 18 : index
    %136 = vector.load %arg1[%c1_74, %c0_75, %c18_76] : memref<2x8x396xf32, #tpu.memory_space<vmem>>, vector<1x8x324xf32>
    %137 = vector.shape_cast %136 : vector<1x8x324xf32> to vector<8x324xf32>
    %c1_77 = arith.constant 1 : index
    %c0_78 = arith.constant 0 : index
    %c0_79 = arith.constant 0 : index
    %138 = vector.load %arg2[%c1_77, %c0_78, %c0_79] : memref<9x8x1xf32, #tpu.memory_space<vmem>>, vector<1x8x1xf32>
    %139 = vector.shape_cast %138 : vector<1x8x1xf32> to vector<8x1xf32>
    %140 = vector.broadcast %139 : vector<8x1xf32> to vector<8x324xf32>
    %141 = arith.mulf %137, %140 : vector<8x324xf32>
    %142 = arith.addf %135, %141 : vector<8x324xf32>
    %c1_80 = arith.constant 1 : index
    %c0_81 = arith.constant 0 : index
    %c19_82 = arith.constant 19 : index
    %143 = vector.load %arg1[%c1_80, %c0_81, %c19_82] : memref<2x8x396xf32, #tpu.memory_space<vmem>>, vector<1x8x324xf32>
    %144 = vector.shape_cast %143 : vector<1x8x324xf32> to vector<8x324xf32>
    %c2_83 = arith.constant 2 : index
    %c0_84 = arith.constant 0 : index
    %c0_85 = arith.constant 0 : index
    %145 = vector.load %arg2[%c2_83, %c0_84, %c0_85] : memref<9x8x1xf32, #tpu.memory_space<vmem>>, vector<1x8x1xf32>
    %146 = vector.shape_cast %145 : vector<1x8x1xf32> to vector<8x1xf32>
    %147 = vector.broadcast %146 : vector<8x1xf32> to vector<8x324xf32>
    %148 = arith.mulf %144, %147 : vector<8x324xf32>
    %149 = arith.addf %142, %148 : vector<8x324xf32>
    %c1_86 = arith.constant 1 : index
    %c0_87 = arith.constant 0 : index
    %c35_88 = arith.constant 35 : index
    %150 = vector.load %arg1[%c1_86, %c0_87, %c35_88] : memref<2x8x396xf32, #tpu.memory_space<vmem>>, vector<1x8x324xf32>
    %151 = vector.shape_cast %150 : vector<1x8x324xf32> to vector<8x324xf32>
    %c3_89 = arith.constant 3 : index
    %c0_90 = arith.constant 0 : index
    %c0_91 = arith.constant 0 : index
    %152 = vector.load %arg2[%c3_89, %c0_90, %c0_91] : memref<9x8x1xf32, #tpu.memory_space<vmem>>, vector<1x8x1xf32>
    %153 = vector.shape_cast %152 : vector<1x8x1xf32> to vector<8x1xf32>
    %154 = vector.broadcast %153 : vector<8x1xf32> to vector<8x324xf32>
    %155 = arith.mulf %151, %154 : vector<8x324xf32>
    %156 = arith.addf %149, %155 : vector<8x324xf32>
    %c1_92 = arith.constant 1 : index
    %c0_93 = arith.constant 0 : index
    %c36_94 = arith.constant 36 : index
    %157 = vector.load %arg1[%c1_92, %c0_93, %c36_94] : memref<2x8x396xf32, #tpu.memory_space<vmem>>, vector<1x8x324xf32>
    %158 = vector.shape_cast %157 : vector<1x8x324xf32> to vector<8x324xf32>
    %c4_95 = arith.constant 4 : index
    %c0_96 = arith.constant 0 : index
    %c0_97 = arith.constant 0 : index
    %159 = vector.load %arg2[%c4_95, %c0_96, %c0_97] : memref<9x8x1xf32, #tpu.memory_space<vmem>>, vector<1x8x1xf32>
    %160 = vector.shape_cast %159 : vector<1x8x1xf32> to vector<8x1xf32>
    %161 = vector.broadcast %160 : vector<8x1xf32> to vector<8x324xf32>
    %162 = arith.mulf %158, %161 : vector<8x324xf32>
    %163 = arith.addf %156, %162 : vector<8x324xf32>
    %c1_98 = arith.constant 1 : index
    %c0_99 = arith.constant 0 : index
    %c37_100 = arith.constant 37 : index
    %164 = vector.load %arg1[%c1_98, %c0_99, %c37_100] : memref<2x8x396xf32, #tpu.memory_space<vmem>>, vector<1x8x324xf32>
    %165 = vector.shape_cast %164 : vector<1x8x324xf32> to vector<8x324xf32>
    %c5_101 = arith.constant 5 : index
    %c0_102 = arith.constant 0 : index
    %c0_103 = arith.constant 0 : index
    %166 = vector.load %arg2[%c5_101, %c0_102, %c0_103] : memref<9x8x1xf32, #tpu.memory_space<vmem>>, vector<1x8x1xf32>
    %167 = vector.shape_cast %166 : vector<1x8x1xf32> to vector<8x1xf32>
    %168 = vector.broadcast %167 : vector<8x1xf32> to vector<8x324xf32>
    %169 = arith.mulf %165, %168 : vector<8x324xf32>
    %170 = arith.addf %163, %169 : vector<8x324xf32>
    %c1_104 = arith.constant 1 : index
    %c0_105 = arith.constant 0 : index
    %c53_106 = arith.constant 53 : index
    %171 = vector.load %arg1[%c1_104, %c0_105, %c53_106] : memref<2x8x396xf32, #tpu.memory_space<vmem>>, vector<1x8x324xf32>
    %172 = vector.shape_cast %171 : vector<1x8x324xf32> to vector<8x324xf32>
    %c6_107 = arith.constant 6 : index
    %c0_108 = arith.constant 0 : index
    %c0_109 = arith.constant 0 : index
    %173 = vector.load %arg2[%c6_107, %c0_108, %c0_109] : memref<9x8x1xf32, #tpu.memory_space<vmem>>, vector<1x8x1xf32>
    %174 = vector.shape_cast %173 : vector<1x8x1xf32> to vector<8x1xf32>
    %175 = vector.broadcast %174 : vector<8x1xf32> to vector<8x324xf32>
    %176 = arith.mulf %172, %175 : vector<8x324xf32>
    %177 = arith.addf %170, %176 : vector<8x324xf32>
    %c1_110 = arith.constant 1 : index
    %c0_111 = arith.constant 0 : index
    %c54_112 = arith.constant 54 : index
    %178 = vector.load %arg1[%c1_110, %c0_111, %c54_112] : memref<2x8x396xf32, #tpu.memory_space<vmem>>, vector<1x8x324xf32>
    %179 = vector.shape_cast %178 : vector<1x8x324xf32> to vector<8x324xf32>
    %c7_113 = arith.constant 7 : index
    %c0_114 = arith.constant 0 : index
    %c0_115 = arith.constant 0 : index
    %180 = vector.load %arg2[%c7_113, %c0_114, %c0_115] : memref<9x8x1xf32, #tpu.memory_space<vmem>>, vector<1x8x1xf32>
    %181 = vector.shape_cast %180 : vector<1x8x1xf32> to vector<8x1xf32>
    %182 = vector.broadcast %181 : vector<8x1xf32> to vector<8x324xf32>
    %183 = arith.mulf %179, %182 : vector<8x324xf32>
    %184 = arith.addf %177, %183 : vector<8x324xf32>
    %c1_116 = arith.constant 1 : index
    %c0_117 = arith.constant 0 : index
    %c55_118 = arith.constant 55 : index
    %185 = vector.load %arg1[%c1_116, %c0_117, %c55_118] : memref<2x8x396xf32, #tpu.memory_space<vmem>>, vector<1x8x324xf32>
    %186 = vector.shape_cast %185 : vector<1x8x324xf32> to vector<8x324xf32>
    %c8_119 = arith.constant 8 : index
    %c0_120 = arith.constant 0 : index
    %c0_121 = arith.constant 0 : index
    %187 = vector.load %arg2[%c8_119, %c0_120, %c0_121] : memref<9x8x1xf32, #tpu.memory_space<vmem>>, vector<1x8x1xf32>
    %188 = vector.shape_cast %187 : vector<1x8x1xf32> to vector<8x1xf32>
    %189 = vector.broadcast %188 : vector<8x1xf32> to vector<8x324xf32>
    %190 = arith.mulf %186, %189 : vector<8x324xf32>
    %191 = arith.addf %184, %190 : vector<8x324xf32>
    %c0_122 = arith.constant 0 : index
    %c0_123 = arith.constant 0 : index
    %192 = vector.load %arg3[%c0_122, %c0_123] : memref<8x1xf32, #tpu.memory_space<vmem>>, vector<8x1xf32>
    %193 = vector.broadcast %192 : vector<8x1xf32> to vector<8x324xf32>
    %194 = arith.addf %191, %193 : vector<8x324xf32>
    %cst_124 = arith.constant 0.000000e+00 : f32
    %cst_125 = arith.constant 6.000000e+00 : f32
    %195 = vector.broadcast %cst_124 : f32 to vector<8x324xf32>
    %196 = arith.maximumf %195, %194 : vector<8x324xf32>
    %197 = vector.broadcast %cst_125 : f32 to vector<8x324xf32>
    %198 = arith.minimumf %197, %196 : vector<8x324xf32>
    %c0_126 = arith.constant 0 : index
    %c0_127 = arith.constant 0 : index
    %c0_128 = arith.constant 0 : index
    %199 = vector.load %arg4[%c0_126, %c0_127, %c0_128] : memref<8x8x1xf32, #tpu.memory_space<vmem>>, vector<1x8x1xf32>
    %200 = vector.shape_cast %199 : vector<1x8x1xf32> to vector<8x1xf32>
    %201 = vector.extract_strided_slice %198 {offsets = [0, 0], sizes = [1, 324], strides = [1, 1]} : vector<8x324xf32> to vector<1x324xf32>
    %202 = vector.broadcast %200 : vector<8x1xf32> to vector<8x324xf32>
    %203 = vector.broadcast %201 : vector<1x324xf32> to vector<8x324xf32>
    %204 = arith.mulf %202, %203 : vector<8x324xf32>
    %c1_129 = arith.constant 1 : index
    %c0_130 = arith.constant 0 : index
    %c0_131 = arith.constant 0 : index
    %205 = vector.load %arg4[%c1_129, %c0_130, %c0_131] : memref<8x8x1xf32, #tpu.memory_space<vmem>>, vector<1x8x1xf32>
    %206 = vector.shape_cast %205 : vector<1x8x1xf32> to vector<8x1xf32>
    %207 = vector.extract_strided_slice %198 {offsets = [1, 0], sizes = [1, 324], strides = [1, 1]} : vector<8x324xf32> to vector<1x324xf32>
    %208 = vector.broadcast %206 : vector<8x1xf32> to vector<8x324xf32>
    %209 = vector.broadcast %207 : vector<1x324xf32> to vector<8x324xf32>
    %210 = arith.mulf %208, %209 : vector<8x324xf32>
    %211 = arith.addf %204, %210 : vector<8x324xf32>
    %c2_132 = arith.constant 2 : index
    %c0_133 = arith.constant 0 : index
    %c0_134 = arith.constant 0 : index
    %212 = vector.load %arg4[%c2_132, %c0_133, %c0_134] : memref<8x8x1xf32, #tpu.memory_space<vmem>>, vector<1x8x1xf32>
    %213 = vector.shape_cast %212 : vector<1x8x1xf32> to vector<8x1xf32>
    %214 = vector.extract_strided_slice %198 {offsets = [2, 0], sizes = [1, 324], strides = [1, 1]} : vector<8x324xf32> to vector<1x324xf32>
    %215 = vector.broadcast %213 : vector<8x1xf32> to vector<8x324xf32>
    %216 = vector.broadcast %214 : vector<1x324xf32> to vector<8x324xf32>
    %217 = arith.mulf %215, %216 : vector<8x324xf32>
    %218 = arith.addf %211, %217 : vector<8x324xf32>
    %c3_135 = arith.constant 3 : index
    %c0_136 = arith.constant 0 : index
    %c0_137 = arith.constant 0 : index
    %219 = vector.load %arg4[%c3_135, %c0_136, %c0_137] : memref<8x8x1xf32, #tpu.memory_space<vmem>>, vector<1x8x1xf32>
    %220 = vector.shape_cast %219 : vector<1x8x1xf32> to vector<8x1xf32>
    %221 = vector.extract_strided_slice %198 {offsets = [3, 0], sizes = [1, 324], strides = [1, 1]} : vector<8x324xf32> to vector<1x324xf32>
    %222 = vector.broadcast %220 : vector<8x1xf32> to vector<8x324xf32>
    %223 = vector.broadcast %221 : vector<1x324xf32> to vector<8x324xf32>
    %224 = arith.mulf %222, %223 : vector<8x324xf32>
    %225 = arith.addf %218, %224 : vector<8x324xf32>
    %c4_138 = arith.constant 4 : index
    %c0_139 = arith.constant 0 : index
    %c0_140 = arith.constant 0 : index
    %226 = vector.load %arg4[%c4_138, %c0_139, %c0_140] : memref<8x8x1xf32, #tpu.memory_space<vmem>>, vector<1x8x1xf32>
    %227 = vector.shape_cast %226 : vector<1x8x1xf32> to vector<8x1xf32>
    %228 = vector.extract_strided_slice %198 {offsets = [4, 0], sizes = [1, 324], strides = [1, 1]} : vector<8x324xf32> to vector<1x324xf32>
    %229 = vector.broadcast %227 : vector<8x1xf32> to vector<8x324xf32>
    %230 = vector.broadcast %228 : vector<1x324xf32> to vector<8x324xf32>
    %231 = arith.mulf %229, %230 : vector<8x324xf32>
    %232 = arith.addf %225, %231 : vector<8x324xf32>
    %c5_141 = arith.constant 5 : index
    %c0_142 = arith.constant 0 : index
    %c0_143 = arith.constant 0 : index
    %233 = vector.load %arg4[%c5_141, %c0_142, %c0_143] : memref<8x8x1xf32, #tpu.memory_space<vmem>>, vector<1x8x1xf32>
    %234 = vector.shape_cast %233 : vector<1x8x1xf32> to vector<8x1xf32>
    %235 = vector.extract_strided_slice %198 {offsets = [5, 0], sizes = [1, 324], strides = [1, 1]} : vector<8x324xf32> to vector<1x324xf32>
    %236 = vector.broadcast %234 : vector<8x1xf32> to vector<8x324xf32>
    %237 = vector.broadcast %235 : vector<1x324xf32> to vector<8x324xf32>
    %238 = arith.mulf %236, %237 : vector<8x324xf32>
    %239 = arith.addf %232, %238 : vector<8x324xf32>
    %c6_144 = arith.constant 6 : index
    %c0_145 = arith.constant 0 : index
    %c0_146 = arith.constant 0 : index
    %240 = vector.load %arg4[%c6_144, %c0_145, %c0_146] : memref<8x8x1xf32, #tpu.memory_space<vmem>>, vector<1x8x1xf32>
    %241 = vector.shape_cast %240 : vector<1x8x1xf32> to vector<8x1xf32>
    %242 = vector.extract_strided_slice %198 {offsets = [6, 0], sizes = [1, 324], strides = [1, 1]} : vector<8x324xf32> to vector<1x324xf32>
    %243 = vector.broadcast %241 : vector<8x1xf32> to vector<8x324xf32>
    %244 = vector.broadcast %242 : vector<1x324xf32> to vector<8x324xf32>
    %245 = arith.mulf %243, %244 : vector<8x324xf32>
    %246 = arith.addf %239, %245 : vector<8x324xf32>
    %c7_147 = arith.constant 7 : index
    %c0_148 = arith.constant 0 : index
    %c0_149 = arith.constant 0 : index
    %247 = vector.load %arg4[%c7_147, %c0_148, %c0_149] : memref<8x8x1xf32, #tpu.memory_space<vmem>>, vector<1x8x1xf32>
    %248 = vector.shape_cast %247 : vector<1x8x1xf32> to vector<8x1xf32>
    %249 = vector.extract_strided_slice %198 {offsets = [7, 0], sizes = [1, 324], strides = [1, 1]} : vector<8x324xf32> to vector<1x324xf32>
    %250 = vector.broadcast %248 : vector<8x1xf32> to vector<8x324xf32>
    %251 = vector.broadcast %249 : vector<1x324xf32> to vector<8x324xf32>
    %252 = arith.mulf %250, %251 : vector<8x324xf32>
    %253 = arith.addf %246, %252 : vector<8x324xf32>
    %c0_150 = arith.constant 0 : index
    %c0_151 = arith.constant 0 : index
    %254 = vector.load %arg5[%c0_150, %c0_151] : memref<8x1xf32, #tpu.memory_space<vmem>>, vector<8x1xf32>
    %255 = vector.broadcast %254 : vector<8x1xf32> to vector<8x324xf32>
    %256 = arith.addf %253, %255 : vector<8x324xf32>
    %c1_152 = arith.constant 1 : index
    %c0_153 = arith.constant 0 : index
    %c0_154 = arith.constant 0 : index
    %257 = vector.load %arg6[%c1_152, %c0_153, %c0_154] : memref<2x8x324xf32, #tpu.memory_space<vmem>>, vector<1x8x324xf32>
    %258 = vector.shape_cast %257 : vector<1x8x324xf32> to vector<8x324xf32>
    %259 = vector.shape_cast %256 : vector<8x324xf32> to vector<1x8x324xf32>
    tpu.vector_store %arg6[%c1_152, %c0_153, %c0_154], %259 {strides = array<i32>} : memref<2x8x324xf32, #tpu.memory_space<vmem>>, vector<1x8x324xf32>,
    return
  }
  func.func @transform_0(%arg0: i32) -> (i32, i32, i32) {
    %c0_i32 = arith.constant 0 : i32
    %c0_i32_0 = arith.constant 0 : i32
    %c0_i32_1 = arith.constant 0 : i32
    return %arg0, %c0_i32, %c0_i32_0 : i32, i32, i32
  }
  func.func @transform_1(%arg0: i32) -> (i32, i32, i32) {
    %c0_i32 = arith.constant 0 : i32
    %c0_i32_0 = arith.constant 0 : i32
    %c0_i32_1 = arith.constant 0 : i32
    %c0_i32_2 = arith.constant 0 : i32
    return %c0_i32, %c0_i32_0, %c0_i32_1 : i32, i32, i32
  }
  func.func @transform_2(%arg0: i32) -> (i32, i32) {
    %c0_i32 = arith.constant 0 : i32
    %c0_i32_0 = arith.constant 0 : i32
    %c0_i32_1 = arith.constant 0 : i32
    return %c0_i32, %c0_i32_0 : i32, i32
  }
  func.func @transform_3(%arg0: i32) -> (i32, i32, i32) {
    %c0_i32 = arith.constant 0 : i32
    %c0_i32_0 = arith.constant 0 : i32
    %c0_i32_1 = arith.constant 0 : i32
    %c0_i32_2 = arith.constant 0 : i32
    return %c0_i32, %c0_i32_0, %c0_i32_1 : i32, i32, i32
  }
  func.func @transform_4(%arg0: i32) -> (i32, i32) {
    %c0_i32 = arith.constant 0 : i32
    %c0_i32_0 = arith.constant 0 : i32
    %c0_i32_1 = arith.constant 0 : i32
    return %c0_i32, %c0_i32_0 : i32, i32
  }
  func.func @transform_5(%arg0: i32) -> (i32, i32, i32) {
    %c0_i32 = arith.constant 0 : i32
    %c0_i32_0 = arith.constant 0 : i32
    %c0_i32_1 = arith.constant 0 : i32
    return %arg0, %c0_i32, %c0_i32_0 : i32, i32, i32
  }
}

</mosaic_0001>

<bundles_post_ra>
// kernel: tpu_custom_call.1
= control target key start
LH: loop header
LB: loop body
LE: loop exit
PB: predicated region body
PF: predicated region fallthrough
CT: control target
= control target key end

     0   :  { %v1034_v2 = vmov 0   ;;  %s1450_s0 = inlined_call_operand.vmem [shape: f32[2,8,396], index: 0, kind: input, shape index: {}]   ;;  %s1451_s1 = inlined_call_operand.vmem [shape: f32[9,8,1], index: 1, kind: input, shape index: {}]   ;;  %s1452_s2 = inlined_call_operand.vmem [shape: f32[8,1], index: 2, kind: input, shape index: {}]   ;;  %s1453_s3 = inlined_call_operand.vmem [shape: f32[8,8,1], index: 3, kind: input, shape index: {}]   ;;  %s1454_s4 = inlined_call_operand.vmem [shape: f32[8,1], index: 4, kind: input, shape index: {}]   ;;  %s1455_s5 = inlined_call_operand.hbm [shape: f32[2,8,324], index: 5, kind: output, shape index: {}]  }
   0x1   :  { %v965_v0 = vld [vmem:[%s1451_s1 + $0x10] sm:$0xff]  ;;  %v24_v1 = vld [vmem:[%s1451_s1] sm:$0xff]  ;;  %1011 = vset.pattern.permute.xlu1 %v1034_v2  ;;  %1010 = vset.pattern.permute.xlu0 %v1034_v2  ;;  %v966_v3 = vld [vmem:[%s1451_s1 + $0x18] sm:$0xff] }
   0x2   :  { %65 = vperm.xlu1 %1011, %v965_v0   ;;  %27 = vperm.xlu0 %1010, %v24_v1   ;;  %v964_v4 = vld [vmem:[%s1451_s1 + $0x8] sm:$0xff] }
   0x3   :  { %10 = vsyncpa [#allocation3], 0  ;;  %v967_v5 = vld [vmem:[%s1451_s1 + $0x20] sm:$0xff]  ;;  %v968_v6 = vld [vmem:[%s1451_s1 + $0x28] sm:$0xff]  ;;  %s1036_s18 = smov 126   ;;  %s1037_s19 = smov 110  }
   0x4   :  { %v969_v7 = vld [vmem:[%s1451_s1 + $0x30] sm:$0xff]  ;;  %v970_v8 = vld [vmem:[%s1451_s1 + $0x38] sm:$0xff]  ;;  %v971_v9 = vld [vmem:[%s1451_s1 + $0x40] sm:$0xff]  ;;  %s1038_s20 = smov 109   ;;  %s1039_s21 = smov 108   ;;  %vm52_vm0 = vcmask 1039360  }
   0x5   :  { %v257_v10 = vld [vmem:[%s1452_s2] sm:$0xff]  ;;  %v1115_v12 = vld [vmem:[%s1450_s0 + $0x8] sm:$0xff]  ;;  %v1120_v13 = vld [vmem:[%s1450_s0 + $0x10] sm:$0xff]  ;;  %s1035_s2 = smov 127   ;;  %s1041_s28 = smov 91   ;;  %vm80_vm1 = vcmask 1031168  }
   0x6   :  { %93 = vperm.xlu1 %1011, %v966_v3   ;;  %37 = vperm.xlu0 %1010, %v964_v4   ;;  %v1110_v11 = vld [vmem:[%s1450_s0] sm:$0xff]  ;;  %v1159_v37 = vld [vmem:[%s1450_s0 + $0x28] sm:$0xff]  ;;  %v1174_v43 = vld [vmem:[%s1450_s0 + $0x30] sm:$0xff]  ;;  %s1042_s29 = smov 90   ;;  %vm108_vm2 = vcmask 900096   ;;  %vm136_vm3 = vcmask 891904  }
   0x7   :  { %v1165_v40 = vld [vmem:[%s1450_s0 + $0x20] sm:$0xff]  ;;  %s1040_s0 = smov 92   ;;  %vm164_vm4 = vcmask 883712   ;;  %vm192_vm5 = vcmask 752640   ;;  %vm220_vm6 = vcmask 744448   ;;  %vm248_vm7 = vcmask 736256  }
   0x8   :  { %vm486_vm8 = vcmask 908288   ;;  %vm494_vm9 = vcmask 556032  }
   0xa   :  { %512 = vperm.xlu1 %1011, %v964_v4   ;;  %538 = vperm.xlu0 %1010, %v965_v0  }
   0xe   :  { %564 = vperm.xlu1 %1011, %v966_v3   ;;  %121 = vperm.xlu0 %1010, %v967_v5  }
  0x12   :  { %590 = vperm.xlu1 %1011, %v967_v5   ;;  %149 = vperm.xlu0 %1010, %v968_v6  }
  0x16   :  { %616 = vperm.xlu1 %1011, %v968_v6   ;;  %177 = vperm.xlu0 %1010, %v969_v7  }
  0x1a   :  { %642 = vperm.xlu1 %1011, %v969_v7   ;;  %205 = vperm.xlu0 %1010, %v970_v8  }
  0x1e   :  { %668 = vperm.xlu1 %1011, %v970_v8   ;;  %233 = vperm.xlu0 %1010, %v971_v9  }
  0x22   :  { %694 = vperm.xlu1 %1011, %v971_v9   ;;  %503 = vperm.xlu0 %1010, %v24_v1  }
  0x26   :  { %260 = vperm.xlu1 %1011, %v257_v10  }
  0x2a   :  { %720 = vperm.xlu1 %1011, %v257_v10  }
  0x7d   :  { %v28_v14 = vpop.permute.xlu0 %27  ;;  %v66_v21 = vpop.permute.xlu1 %65 }
  0x7e   :  { %v1123_v15 = vmul.f32 %v28_v14, %v1110_v11  ;;  %v1126_v16 = vmul.f32 %v28_v14, %v1115_v12  ;;  %v1129_v17 = vmul.f32 %v28_v14, %v1120_v13  ;;  %v68_v22 = vmul.f32 %v66_v21, %v1110_v11 }
  0x7f   :  { %v69_v25 = vmul.f32 %v66_v21, %v1115_v12  ;;  %v70_v26 = vmul.f32 %v66_v21, %v1120_v13 }
  0x81   :  { %v38_v18 = vpop.permute.xlu0 %37  ;;  %v94_v27 = vpop.permute.xlu1 %93 }
  0x82   :  { %v40_v19 = vmul.f32 %v38_v18, %v1110_v11  ;;  %v42_v20 = vmul.f32 %v38_v18, %v1120_v13  ;;  %v41_v23 = vmul.f32 %v38_v18, %v1115_v12  ;;  %v97_v29 = vmul.f32 %v94_v27, %v1115_v12 }
  0x83   :  { %v96_v30 = vmul.f32 %v94_v27, %v1110_v11  ;;  %v98_v32 = vmul.f32 %v94_v27, %v1120_v13  ;;  %v991_v27 = vld [vmem:[%s1453_s3 + $0x10] sm:$0xff] }
  0x84   :  { %46 = vrot.lane.b32.xlu1 %v40_v19, %s1035_s2  ;;  %50 = vrot.lane.b32.xlu0 %v42_v20, %s1035_s2 }
  0x85   :  { %v539_v24 = vpop.permute.xlu0 %538  ;;  %v513_v38 = vpop.permute.xlu1 %512 }
  0x86   :  { %v516_v41 = vmul.f32 %v1159_v37, %v513_v38  ;;  %v515_v42 = vmul.f32 %v1165_v40, %v513_v38  ;;  %v541_v44 = vmul.f32 %v1165_v40, %v539_v24  ;;  %v517_v45 = vmul.f32 %v1174_v43, %v513_v38  ;;  %v996_v38 = vld [vmem:[%s1453_s3 + $0x38] sm:$0xff] }
  0x87   :  { %v543_v47 = vmul.f32 %v1174_v43, %v539_v24  ;;  %v542_v48 = vmul.f32 %v1159_v37, %v539_v24 }
  0x88   :  { %48 = vrot.lane.b32.xlu1 %v41_v23, %s1035_s2  ;;  %74 = vrot.lane.b32.xlu0 %v68_v22, %s1036_s18 }
  0x89   :  { %v122_v28 = vpop.permute.xlu0 %121  ;;  %v565_v46 = vpop.permute.xlu1 %564 }
  0x8a   :  { %v125_v31 = vmul.f32 %v122_v28, %v1115_v12  ;;  %v124_v35 = vmul.f32 %v122_v28, %v1110_v11  ;;  %v126_v39 = vmul.f32 %v122_v28, %v1120_v13  ;;  %v568_v49 = vmul.f32 %v1159_v37, %v565_v46 }
  0x8b   :  { %v567_v50 = vmul.f32 %v1165_v40, %v565_v46  ;;  %v569_v53 = vmul.f32 %v1174_v43, %v565_v46 }
  0x8c   :  { %76 = vrot.lane.b32.xlu1 %v69_v25, %s1036_s18  ;;  %78 = vrot.lane.b32.xlu0 %v70_v26, %s1036_s18 }
  0x8d   :  { %v150_v33 = vpop.permute.xlu0 %149  ;;  %v591_v51 = vpop.permute.xlu1 %590 }
  0x8e   :  { %v152_v34 = vmul.f32 %v150_v33, %v1110_v11  ;;  %v153_v36 = vmul.f32 %v150_v33, %v1115_v12  ;;  %v593_v52 = vmul.f32 %v1165_v40, %v591_v51  ;;  %v595_v54 = vmul.f32 %v1174_v43, %v591_v51 }
  0x8f   :  { %v594_v55 = vmul.f32 %v1159_v37, %v591_v51  ;;  %v154_v58 = vmul.f32 %v150_v33, %v1120_v13  ;;  %v995_v33 = vld [vmem:[%s1453_s3 + $0x30] sm:$0xff] }
  0x90   :  { %104 = vrot.lane.b32.xlu1 %v97_v29, %s1037_s19  ;;  %102 = vrot.lane.b32.xlu0 %v96_v30, %s1037_s19  ;;  %v993_v29 = vld [vmem:[%s1453_s3 + $0x20] sm:$0xff]  ;;  %v994_v30 = vld [vmem:[%s1453_s3 + $0x28] sm:$0xff] }
  0x91   :  { %v617_v56 = vpop.permute.xlu1 %616  ;;  %v178_v61 = vpop.permute.xlu0 %177 }
  0x92   :  { %v619_v57 = vmul.f32 %v1165_v40, %v617_v56  ;;  %v621_v59 = vmul.f32 %v1174_v43, %v617_v56  ;;  %v620_v60 = vmul.f32 %v1159_v37, %v617_v56  ;;  %v181_v62 = vmul.f32 %v178_v61, %v1115_v12 }
  0x93   :  { %v180_v63 = vmul.f32 %v178_v61, %v1110_v11  ;;  %v182_v2 = vmul.f32 %v178_v61, %v1120_v13 }
  0x94   :  { %132 = vrot.lane.b32.xlu1 %v125_v31, %s1038_s20  ;;  %106 = vrot.lane.b32.xlu0 %v98_v32, %s1037_s19 }
  0x95   :  { %v643_v0 = vpop.permute.xlu1 %642  ;;  %v206_v5 = vpop.permute.xlu0 %205 }
  0x96   :  { %v645_v1 = vmul.f32 %v1165_v40, %v643_v0  ;;  %v647_v3 = vmul.f32 %v1174_v43, %v643_v0  ;;  %v646_v4 = vmul.f32 %v1159_v37, %v643_v0  ;;  %v209_v6 = vmul.f32 %v206_v5, %v1115_v12 }
  0x97   :  { %v208_v7 = vmul.f32 %v206_v5, %v1110_v11  ;;  %v210_v10 = vmul.f32 %v206_v5, %v1120_v13 }
  0x98   :  { %158 = vrot.lane.b32.xlu1 %v152_v34, %s1039_s21  ;;  %130 = vrot.lane.b32.xlu0 %v124_v35, %s1038_s20 }
  0x99   :  { %v669_v8 = vpop.permute.xlu1 %668  ;;  %v234_v14 = vpop.permute.xlu0 %233 }
  0x9a   :  { %v672_v9 = vmul.f32 %v1159_v37, %v669_v8  ;;  %v237_v18 = vmul.f32 %v234_v14, %v1115_v12  ;;  %v671_v19 = vmul.f32 %v1165_v40, %v669_v8  ;;  %v673_v22 = vmul.f32 %v1174_v43, %v669_v8  ;;  %v972_v12 = vld [vmem:[%s1453_s3 + $0x8] sm:$0xff] }
  0x9b   :  { %v236_v24 = vmul.f32 %v234_v14, %v1110_v11  ;;  %v238_v25 = vmul.f32 %v234_v14, %v1120_v13  ;;  %v272_v11 = vld [vmem:[%s1453_s3] sm:$0xff]  ;;  %v992_v13 = vld [vmem:[%s1453_s3 + $0x18] sm:$0xff]  ;;  %s1043_s3 = smov 111  }
  0x9c   :  { %160 = vrot.lane.b32.xlu1 %v153_v36, %s1039_s21  ;;  %134 = vrot.lane.b32.xlu0 %v126_v39, %s1038_s20 }
  0x9d   :  { %v695_v20 = vpop.permute.xlu1 %694  ;;  %v504_v32 = vpop.permute.xlu0 %503 }
  0x9e   :  { %v697_v21 = vmul.f32 %v1165_v40, %v695_v20  ;;  %v699_v23 = vmul.f32 %v1174_v43, %v695_v20  ;;  %v698_v26 = vmul.f32 %v1159_v37, %v695_v20 }
  0xa0   :  { %523 = vrot.lane.b32.xlu1 %v516_v41, %s1035_s2  ;;  %521 = vrot.lane.b32.xlu0 %v515_v42, %s1035_s2 }
  0xa1   :  { %v1236_v28 = vpop.permute.xlu1 %260 }
  0xa4   :  { %547 = vrot.lane.b32.xlu1 %v541_v44, %s1036_s18  ;;  %525 = vrot.lane.b32.xlu0 %v517_v45, %s1035_s2 }
  0xa5   :  { %v1244_v31 = vpop.permute.xlu1 %720 }
  0xa8   :  { %551 = vrot.lane.b32.xlu1 %v543_v47, %s1036_s18  ;;  %549 = vrot.lane.b32.xlu0 %v542_v48, %s1036_s18 }
  0xac   :  { %575 = vrot.lane.b32.xlu1 %v568_v49, %s1037_s19  ;;  %573 = vrot.lane.b32.xlu0 %v567_v50, %s1037_s19 }
  0xb0   :  { %599 = vrot.lane.b32.xlu1 %v593_v52, %s1038_s20  ;;  %577 = vrot.lane.b32.xlu0 %v569_v53, %s1037_s19 }
  0xb4   :  { %603 = vrot.lane.b32.xlu1 %v595_v54, %s1038_s20  ;;  %601 = vrot.lane.b32.xlu0 %v594_v55, %s1038_s20 }
  0xb8   :  { %625 = vrot.lane.b32.xlu1 %v619_v57, %s1039_s21  ;;  %162 = vrot.lane.b32.xlu0 %v154_v58, %s1039_s21 }
  0xbc   :  { %629 = vrot.lane.b32.xlu1 %v621_v59, %s1039_s21  ;;  %627 = vrot.lane.b32.xlu0 %v620_v60, %s1039_s21 }
  0xc0   :  { %188 = vrot.lane.b32.xlu1 %v181_v62, %s1040_s0  ;;  %186 = vrot.lane.b32.xlu0 %v180_v63, %s1040_s0 }
  0xc4   :  { %651 = vrot.lane.b32.xlu1 %v645_v1, %s1040_s0  ;;  %190 = vrot.lane.b32.xlu0 %v182_v2, %s1040_s0 }
  0xc8   :  { %655 = vrot.lane.b32.xlu1 %v647_v3, %s1040_s0  ;;  %653 = vrot.lane.b32.xlu0 %v646_v4, %s1040_s0 }
  0xcc   :  { %216 = vrot.lane.b32.xlu1 %v209_v6, %s1041_s28  ;;  %214 = vrot.lane.b32.xlu0 %v208_v7, %s1041_s28 }
  0xd0   :  { %679 = vrot.lane.b32.xlu1 %v672_v9, %s1041_s28  ;;  %218 = vrot.lane.b32.xlu0 %v210_v10, %s1041_s28  ;;  %v506_v9 = vmul.f32 %v1165_v40, %v504_v32 }
  0xd4   :  { %244 = vrot.lane.b32.xlu1 %v237_v18, %s1042_s29  ;;  %677 = vrot.lane.b32.xlu0 %v671_v19, %s1041_s28  ;;  %v508_v19 = vmul.f32 %v1174_v43, %v504_v32 }
  0xd8   :  { %703 = vrot.lane.b32.xlu1 %v697_v21, %s1042_s29  ;;  %681 = vrot.lane.b32.xlu0 %v673_v22, %s1041_s28  ;;  %v507_v21 = vmul.f32 %v1159_v37, %v504_v32 }
  0xdc   :  { %707 = vrot.lane.b32.xlu1 %v699_v23, %s1042_s29  ;;  %242 = vrot.lane.b32.xlu0 %v236_v24, %s1042_s29 }
  0xe0   :  { %297 = vperm.xlu1 %1011, %v972_v12   ;;  %246 = vrot.lane.b32.xlu0 %v238_v25, %s1042_s29 }
  0xe4   :  { %756 = vperm.xlu1 %1011, %v972_v12   ;;  %705 = vrot.lane.b32.xlu0 %v698_v26, %s1042_s29 }
  0xe8   :  { %780 = vperm.xlu1 %1011, %v991_v27   ;;  %275 = vperm.xlu0 %1010, %v272_v11  }
  0xec   :  { %804 = vperm.xlu1 %1011, %v992_v13   ;;  %735 = vperm.xlu0 %1010, %v272_v11  }
  0xf0   :  { %828 = vperm.xlu1 %1011, %v993_v29   ;;  %322 = vperm.xlu0 %1010, %v991_v27  }
  0xf4   :  { %852 = vperm.xlu1 %1011, %v994_v30   ;;  %347 = vperm.xlu0 %1010, %v992_v13  }
  0xf6   :  { %v47_v34 = vpop.permute.xlu1 %46  ;;  %v51_v35 = vpop.permute.xlu0 %50 }
  0xf7   :  { %v60_v36 = vadd.f32 %v51_v35, %v1129_v17  ;;  %v921_v17 = vld [vmem:[%s1454_s4] sm:$0xff]  ;;  %s1044_s4 = smov [#allocation2]  }
  0xf8   :  { %876 = vperm.xlu1 %1011, %v995_v33   ;;  %372 = vperm.xlu0 %1010, %v993_v29   ;;  %s953_s21 = sshll.u32 %s1044_s4, 4  ;;  %s954_s21 = int_to_ptr.vmem [resolvable:$true] %s953_s21 }
  0xf9   :  { %s1012_s22 = scalar_lea.vmem %s954_s21, 768  ;;  %p1017_p1 = scmp.lt.s32.totalorder %s954_s21, %s954_s21 }
  0xfa   :  { %v49_v39 = vpop.permute.xlu1 %48  ;;  %v75_v41 = vpop.permute.xlu0 %74  ;;  %p1013_p0 = scmp.ne.s32.totalorder %s954_s21, %s1012_s22  ;;  %p1018_p2 = scmp.lt.s32.totalorder %s1012_s22, %s1012_s22 }
  0xfb   :  { %v53_v42 = vsel %vm52_vm0, %v47_v34, %v49_v39  ;;  %v54_v44 = vsel %vm52_vm0, %v49_v39, %v51_v35 }
  0xfc   :  { %v58_v45 = vadd.f32 %v53_v42, %v1123_v15  ;;  %v59_v46 = vadd.f32 %v54_v44, %v1126_v16  ;;  %900 = vperm.xlu1 %1011, %v996_v38   ;;  %397 = vperm.xlu0 %1010, %v994_v30   ;;  %p1019_p3 = por %p1018_p2, %p1017_p1 }
  0xfe   :  { %v77_v47 = vpop.permute.xlu1 %76  ;;  %v79_v48 = vpop.permute.xlu0 %78  ;;  %p1020_p4 = pnand %p1019_p3, %p1013_p0 }
  0xff   :  { %v81_v49 = vsel %vm80_vm1, %v75_v41, %v77_v47  ;;  %v88_v50 = vadd.f32 %v79_v48, %v60_v36  ;;  %v82_v51 = vsel %vm80_vm1, %v77_v47, %v79_v48 }
 0x100   :  { %v86_v52 = vadd.f32 %v81_v49, %v58_v45  ;;  %924 = vperm.xlu1 %1011, %v921_v17   ;;  %v87_v53 = vadd.f32 %v82_v51, %v59_v46  ;;  %422 = vperm.xlu0 %1010, %v995_v33  }
 0x102   :  { %v105_v15 = vpop.permute.xlu1 %104  ;;  %v103_v16 = vpop.permute.xlu0 %102 }
 0x103   :  { %v109_v54 = vsel %vm108_vm2, %v103_v16, %v105_v15 }
 0x104   :  { %v114_v55 = vadd.f32 %v109_v54, %v86_v52  ;;  %447 = vperm.xlu0 %1010, %v996_v38  }
 0x106   :  { %v133_v56 = vpop.permute.xlu1 %132  ;;  %v107_v57 = vpop.permute.xlu0 %106 }
 0x107   :  { %v110_v58 = vsel %vm108_vm2, %v105_v15, %v107_v57  ;;  %v116_v59 = vadd.f32 %v107_v57, %v88_v50 }
 0x108   :  { %v115_v60 = vadd.f32 %v110_v58, %v87_v53  ;;  %471 = vperm.xlu0 %1010, %v921_v17  }
 0x10a   :  { %v159_v61 = vpop.permute.xlu1 %158  ;;  %v131_v62 = vpop.permute.xlu0 %130 }
 0x10b   :  { %v137_v63 = vsel %vm136_vm3, %v131_v62, %v133_v56 }
 0x10c   :  { %v142_v0 = vadd.f32 %v137_v63, %v114_v55 }
 0x10e   :  { %v161_v1 = vpop.permute.xlu1 %160  ;;  %v135_v2 = vpop.permute.xlu0 %134 }
 0x10f   :  { %v165_v3 = vsel %vm164_vm4, %v159_v61, %v161_v1  ;;  %v138_v4 = vsel %vm136_vm3, %v133_v56, %v135_v2  ;;  %v144_v5 = vadd.f32 %v135_v2, %v116_v59 }
 0x110   :  { %v1267_v6 = vadd.f32 %v165_v3, %v142_v0  ;;  %v1269_v7 = vadd.f32 %v138_v4, %v115_v60 }
 0x112   :  { %v524_v8 = vpop.permute.xlu1 %523  ;;  %v522_v10 = vpop.permute.xlu0 %521 }
 0x113   :  { %v527_v14 = vsel %vm52_vm0, %v522_v10, %v524_v8 }
 0x114   :  { %v532_v18 = vadd.f32 %v527_v14, %v506_v9 }
 0x116   :  { %v548_v20 = vpop.permute.xlu1 %547  ;;  %v526_v22 = vpop.permute.xlu0 %525 }
 0x117   :  { %v528_v23 = vsel %vm52_vm0, %v524_v8, %v526_v22  ;;  %v534_v24 = vadd.f32 %v526_v22, %v508_v19 }
 0x118   :  { %v533_v12 = vadd.f32 %v528_v23, %v507_v21 }
 0x11a   :  { %v552_v25 = vpop.permute.xlu1 %551  ;;  %v550_v26 = vpop.permute.xlu0 %549 }
 0x11b   :  { %v554_v27 = vsel %vm80_vm1, %v550_v26, %v552_v25  ;;  %v553_v49 = vsel %vm80_vm1, %v548_v20, %v550_v26  ;;  %v560_v50 = vadd.f32 %v552_v25, %v534_v24 }
 0x11c   :  { %v559_v11 = vadd.f32 %v554_v27, %v533_v12  ;;  %v558_v15 = vadd.f32 %v553_v49, %v532_v18 }
 0x11e   :  { %v576_v40 = vpop.permute.xlu1 %575  ;;  %v574_v13 = vpop.permute.xlu0 %573 }
 0x11f   :  { %v579_v52 = vsel %vm108_vm2, %v574_v13, %v576_v40 }
 0x120   :  { %v584_v58 = vadd.f32 %v579_v52, %v558_v15 }
 0x122   :  { %v600_v29 = vpop.permute.xlu1 %599  ;;  %v578_v30 = vpop.permute.xlu0 %577 }
 0x123   :  { %v586_v53 = vadd.f32 %v578_v30, %v560_v50  ;;  %v580_v16 = vsel %vm108_vm2, %v576_v40, %v578_v30 }
 0x124   :  { %v585_v61 = vadd.f32 %v580_v16, %v559_v11 }
 0x126   :  { %v604_v33 = vpop.permute.xlu1 %603  ;;  %v602_v34 = vpop.permute.xlu0 %601 }
 0x127   :  { %v605_v55 = vsel %vm136_vm3, %v600_v29, %v602_v34  ;;  %v612_v56 = vadd.f32 %v604_v33, %v586_v53  ;;  %v606_v59 = vsel %vm136_vm3, %v602_v34, %v604_v33 }
 0x128   :  { %v610_v0 = vadd.f32 %v605_v55, %v584_v58  ;;  %v611_v8 = vadd.f32 %v606_v59, %v585_v61 }
 0x12a   :  { %v626_v43 = vpop.permute.xlu1 %625  ;;  %v163_v35 = vpop.permute.xlu0 %162 }
 0x12b   :  { %v166_v60 = vsel %vm164_vm4, %v161_v1, %v163_v35  ;;  %v172_v2 = vadd.f32 %v163_v35, %v144_v5 }
 0x12c   :  { %v171_v9 = vadd.f32 %v166_v60, %v1269_v7 }
 0x12e   :  { %v630_v36 = vpop.permute.xlu1 %629  ;;  %v628_v37 = vpop.permute.xlu0 %627 }
 0x12f   :  { %v638_v62 = vadd.f32 %v630_v36, %v612_v56  ;;  %v631_v3 = vsel %vm164_vm4, %v626_v43, %v628_v37  ;;  %v632_v1 = vsel %vm164_vm4, %v628_v37, %v630_v36 }
 0x130   :  { %v636_v5 = vadd.f32 %v631_v3, %v610_v0  ;;  %v637_v11 = vadd.f32 %v632_v1, %v611_v8 }
 0x132   :  { %v189_v32 = vpop.permute.xlu1 %188  ;;  %v187_v38 = vpop.permute.xlu0 %186 }
 0x133   :  { %v193_v63 = vsel %vm192_vm5, %v187_v38, %v189_v32 }
 0x134   :  { %v198_v19 = vadd.f32 %v193_v63, %v1267_v6 }
 0x136   :  { %v652_v39 = vpop.permute.xlu1 %651  ;;  %v191_v41 = vpop.permute.xlu0 %190 }
 0x137   :  { %v194_v4 = vsel %vm192_vm5, %v189_v32, %v191_v41  ;;  %v200_v20 = vadd.f32 %v191_v41, %v172_v2  ;;  %v278_v32 = vlaneseq }
 0x138   :  { %v199_v23 = vadd.f32 %v194_v4, %v171_v9 }
 0x139   :  { %v279_v52 = vshrl.u32 %v278_v32, 7 }
 0x13a   :  { %v656_v42 = vpop.permute.xlu1 %655  ;;  %v654_v44 = vpop.permute.xlu0 %653 }
 0x13b   :  { %v664_v10 = vadd.f32 %v656_v42, %v638_v62  ;;  %v657_v25 = vsel %vm192_vm5, %v652_v39, %v654_v44  ;;  %v658_v7 = vsel %vm192_vm5, %v654_v44, %v656_v42  ;;  %v1311_v62 = vsub.s32 2, %v279_v52 }
 0x13c   :  { %v662_v35 = vadd.f32 %v657_v25, %v636_v5  ;;  %v663_v36 = vadd.f32 %v658_v7, %v637_v11  ;;  %v280_v0 = vsub.s32 0, %v279_v52  ;;  %v1315_v2 = vsub.s32 3, %v279_v52 }
 0x13d   :  { %v1317_v3 = vsub.s32 4, %v279_v52 }
 0x13e   :  { %v217_v45 = vpop.permute.xlu1 %216  ;;  %v215_v46 = vpop.permute.xlu0 %214 }
 0x13f   :  { %v221_v14 = vsel %vm220_vm6, %v215_v46, %v217_v45 }
 0x140   :  { %v226_v26 = vadd.f32 %v221_v14, %v198_v19  ;;  %v1325_v14 = vsub.s32 7, %v279_v52 }
 0x142   :  { %v680_v17 = vpop.permute.xlu1 %679  ;;  %v219_v47 = vpop.permute.xlu0 %218 }
 0x143   :  { %v222_v21 = vsel %vm220_vm6, %v217_v45, %v219_v47  ;;  %v228_v27 = vadd.f32 %v219_v47, %v200_v20 }
 0x144   :  { %v227_v40 = vadd.f32 %v222_v21, %v199_v23 }
 0x146   :  { %v245_v48 = vpop.permute.xlu1 %244  ;;  %v678_v51 = vpop.permute.xlu0 %677 }
 0x147   :  { %v683_v13 = vsel %vm220_vm6, %v678_v51, %v680_v17 }
 0x148   :  { %v688_v38 = vadd.f32 %v683_v13, %v662_v35 }
 0x14a   :  { %v704_v54 = vpop.permute.xlu1 %703  ;;  %v682_v57 = vpop.permute.xlu0 %681 }
 0x14b   :  { %v690_v24 = vadd.f32 %v682_v57, %v664_v10  ;;  %v684_v30 = vsel %vm220_vm6, %v680_v17, %v682_v57  ;;  %v1323_v10 = vsub.s32 6, %v279_v52 }
 0x14c   :  { %v689_v39 = vadd.f32 %v684_v30, %v663_v36 }
 0x14e   :  { %v243_v18 = vpop.permute.xlu0 %242  ;;  %v708_v22 = vpop.permute.xlu1 %707 }
 0x14f   :  { %v249_v12 = vsel %vm248_vm7, %v243_v18, %v245_v48  ;;  %v716_v6 = vadd.f32 %v708_v22, %v690_v24 }
 0x150   :  { %v254_v33 = vadd.f32 %v249_v12, %v226_v26 }
 0x151   :  { %v725_v41 = vadd.f32 %v1244_v31, %v716_v6 }
 0x152   :  { %v247_v29 = vpop.permute.xlu0 %246  ;;  %v263_v45 = vadd.f32 %v1236_v28, %v254_v33 }
 0x153   :  { %v250_v34 = vsel %vm248_vm7, %v245_v48, %v247_v29  ;;  %v256_v43 = vadd.f32 %v247_v29, %v228_v27  ;;  %v728_v50 = vmax.f32 %v725_v41, 0.0 }
 0x154   :  { %v255_v37 = vadd.f32 %v250_v34, %v227_v40  ;;  %v266_v15 = vmax.f32 %v263_v45, 0.0 }
 0x155   :  { %v265_v42 = vadd.f32 %v1236_v28, %v256_v43  ;;  %v1305_v57 = vmin.f32 %v728_v50, 6.0 }
 0x156   :  { %v706_v44 = vpop.permute.xlu0 %705  ;;  %v264_v47 = vadd.f32 %v1236_v28, %v255_v37  ;;  %v1309_v60 = vmin.f32 %v266_v15, 6.0 }
 0x157   :  { %v709_v46 = vsel %vm248_vm7, %v704_v54, %v706_v44  ;;  %v710_v17 = vsel %vm248_vm7, %v706_v44, %v708_v22  ;;  %v268_v51 = vmax.f32 %v265_v42, 0.0  ;;  %v302_v54 = vsub.s32 1, %v279_v52 }
 0x158   :  { %v714_v48 = vadd.f32 %v709_v46, %v688_v38  ;;  %v715_v49 = vadd.f32 %v710_v17, %v689_v39  ;;  %v267_v56 = vmax.f32 %v264_v47, 0.0  ;;  %v794_v21 = vrot.slane %v1305_v57, %v1311_v62 }
 0x159   :  { %v1307_v58 = vmin.f32 %v268_v51, 6.0  ;;  %v770_v8 = vrot.slane %v1305_v57, %v302_v54  ;;  %v303_v19 = vrot.slane %v1309_v60, %v302_v54  ;;  %v281_v5 = vrot.slane %v1309_v60, %v280_v0 }
 0x15a   :  { %v723_v16 = vadd.f32 %v1244_v31, %v714_v48  ;;  %v724_v55 = vadd.f32 %v1244_v31, %v715_v49  ;;  %v1313_v63 = vmin.f32 %v267_v56, 6.0  ;;  %v1319_v31 = vsub.s32 5, %v279_v52 }
 0x15b   :  { %v298_v53 = vpop.permute.xlu1 %297  ;;  %v311_v4 = vrot.slane %v1307_v58, %v302_v54  ;;  %v749_v23 = vrot.slane %v1305_v57, %v280_v0  ;;  %v818_v24 = vrot.slane %v1305_v57, %v1315_v2  ;;  %v289_v25 = vrot.slane %v1307_v58, %v280_v0 }
 0x15c   :  { %v726_v28 = vmax.f32 %v723_v16, 0.0  ;;  %v727_v61 = vmax.f32 %v724_v55, 0.0  ;;  %v307_v22 = vrot.slane %v1313_v63, %v302_v54  ;;  %v312_v12 = vmul.f32 %v303_v19, %v298_v53 }
 0x15d   :  { %v328_v7 = vrot.slane %v1309_v60, %v1311_v62  ;;  %v842_v26 = vrot.slane %v1305_v57, %v1317_v3  ;;  %v314_v27 = vmul.f32 %v311_v4, %v298_v53  ;;  %v285_v11 = vrot.slane %v1313_v63, %v280_v0 }
 0x15e   :  { %v1327_v18 = vmin.f32 %v726_v28, 6.0  ;;  %v1329_v1 = vmin.f32 %v727_v61, 6.0  ;;  %v336_v13 = vrot.slane %v1307_v58, %v1311_v62  ;;  %v332_v6 = vrot.slane %v1313_v63, %v1311_v62 }
 0x15f   :  { %v757_v59 = vpop.permute.xlu1 %756  ;;  %v361_v34 = vrot.slane %v1307_v58, %v1315_v2  ;;  %v353_v43 = vrot.slane %v1309_v60, %v1315_v2  ;;  %v313_v35 = vmul.f32 %v307_v22, %v298_v53  ;;  %v357_v37 = vrot.slane %v1313_v63, %v1315_v2 }
 0x160   :  { %v762_v29 = vrot.slane %v1327_v18, %v302_v54  ;;  %v766_v30 = vrot.slane %v1329_v1, %v302_v54  ;;  %v773_v36 = vmul.f32 %v770_v8, %v757_v59  ;;  %v866_v32 = vrot.slane %v1305_v57, %v1319_v31 }
 0x161   :  { %v786_v38 = vrot.slane %v1327_v18, %v1311_v62  ;;  %v741_v39 = vrot.slane %v1327_v18, %v280_v0  ;;  %v386_v41 = vrot.slane %v1307_v58, %v1317_v3  ;;  %v378_v42 = vrot.slane %v1309_v60, %v1317_v3 }
 0x162   :  { %v790_v44 = vrot.slane %v1329_v1, %v1311_v62  ;;  %v745_v45 = vrot.slane %v1329_v1, %v280_v0  ;;  %v810_v46 = vrot.slane %v1327_v18, %v1315_v2  ;;  %v814_v17 = vrot.slane %v1329_v1, %v1315_v2 }
 0x163   :  { %v781_v9 = vpop.permute.xlu1 %780  ;;  %v276_v20 = vpop.permute.xlu0 %275  ;;  %v771_v48 = vmul.f32 %v762_v29, %v757_v59  ;;  %v772_v49 = vmul.f32 %v766_v30, %v757_v59  ;;  %v834_v52 = vrot.slane %v1327_v18, %v1317_v3  ;;  %v838_v61 = vrot.slane %v1329_v1, %v1317_v3 }
 0x164   :  { %v290_v53 = vmul.f32 %v281_v5, %v276_v20  ;;  %v291_v15 = vmul.f32 %v285_v11, %v276_v20  ;;  %v292_v56 = vmul.f32 %v289_v25, %v276_v20  ;;  %v795_v54 = vmul.f32 %v786_v38, %v781_v9 }
 0x165   :  { %v796_v28 = vmul.f32 %v790_v44, %v781_v9  ;;  %v797_v0 = vmul.f32 %v794_v21, %v781_v9  ;;  %v858_v4 = vrot.slane %v1327_v18, %v1319_v31  ;;  %v862_v59 = vrot.slane %v1329_v1, %v1319_v31 }
 0x166   :  { %v382_v8 = vrot.slane %v1313_v63, %v1317_v3  ;;  %v882_v20 = vrot.slane %v1327_v18, %v1323_v10  ;;  %v886_v5 = vrot.slane %v1329_v1, %v1323_v10  ;;  %v890_v9 = vrot.slane %v1305_v57, %v1323_v10 }
 0x167   :  { %v805_v40 = vpop.permute.xlu1 %804  ;;  %v736_v33 = vpop.permute.xlu0 %735  ;;  %v315_v21 = vadd.f32 %v312_v12, %v290_v53  ;;  %v317_v30 = vadd.f32 %v314_v27, %v292_v56  ;;  %v906_v12 = vrot.slane %v1327_v18, %v1325_v14  ;;  %v436_v27 = vrot.slane %v1307_v58, %v1323_v10 }
 0x168   :  { %v750_v50 = vmul.f32 %v741_v39, %v736_v33  ;;  %v751_v16 = vmul.f32 %v745_v45, %v736_v33  ;;  %v752_v55 = vmul.f32 %v749_v23, %v736_v33  ;;  %v316_v23 = vadd.f32 %v313_v35, %v291_v15 }
 0x169   :  { %v819_v33 = vmul.f32 %v810_v46, %v805_v40  ;;  %v820_v38 = vmul.f32 %v814_v17, %v805_v40  ;;  %v411_v39 = vrot.slane %v1307_v58, %v1319_v31  ;;  %v821_v44 = vmul.f32 %v818_v24, %v805_v40 }
 0x16a   :  { %v774_v19 = vadd.f32 %v771_v48, %v750_v50  ;;  %v775_v25 = vadd.f32 %v772_v49, %v751_v16  ;;  %v776_v11 = vadd.f32 %v773_v36, %v752_v55  ;;  %v403_v45 = vrot.slane %v1309_v60, %v1319_v31 }
 0x16b   :  { %v829_v47 = vpop.permute.xlu1 %828  ;;  %v323_v51 = vpop.permute.xlu0 %322  ;;  %v407_v48 = vrot.slane %v1313_v63, %v1319_v31  ;;  %v428_v46 = vrot.slane %v1309_v60, %v1323_v10  ;;  %v453_v62 = vrot.slane %v1309_v60, %v1325_v14 }
 0x16c   :  { %v798_v35 = vadd.f32 %v795_v54, %v774_v19  ;;  %v338_v49 = vmul.f32 %v332_v6, %v323_v51  ;;  %v799_v17 = vadd.f32 %v796_v28, %v775_v25  ;;  %v800_v24 = vadd.f32 %v797_v0, %v776_v11 }
 0x16d   :  { %v339_v40 = vmul.f32 %v336_v13, %v323_v51  ;;  %v843_v50 = vmul.f32 %v834_v52, %v829_v47  ;;  %v337_v53 = vmul.f32 %v328_v7, %v323_v51  ;;  %v844_v15 = vmul.f32 %v838_v61, %v829_v47 }
 0x16e   :  { %v845_v6 = vmul.f32 %v842_v26, %v829_v47  ;;  %v432_v54 = vrot.slane %v1313_v63, %v1323_v10  ;;  %v461_v13 = vrot.slane %v1307_v58, %v1325_v14  ;;  %v822_v7 = vadd.f32 %v819_v33, %v798_v35 }
 0x16f   :  { %v348_v22 = vpop.permute.xlu0 %347  ;;  %v853_v29 = vpop.permute.xlu1 %852  ;;  %v341_v51 = vadd.f32 %v338_v49, %v316_v23  ;;  %v823_v52 = vadd.f32 %v820_v38, %v799_v17  ;;  %v342_v28 = vadd.f32 %v339_v40, %v317_v30  ;;  %v340_v0 = vadd.f32 %v337_v53, %v315_v21 }
 0x170   :  { %v363_v16 = vmul.f32 %v357_v37, %v348_v22  ;;  %v364_v55 = vmul.f32 %v361_v34, %v348_v22  ;;  %v362_v26 = vmul.f32 %v353_v43, %v348_v22  ;;  %v824_v34 = vadd.f32 %v821_v44, %v800_v24 }
 0x171   :  { %v867_v33 = vmul.f32 %v858_v4, %v853_v29  ;;  %v868_v2 = vmul.f32 %v862_v59, %v853_v29  ;;  %v847_v35 = vadd.f32 %v844_v15, %v823_v52  ;;  %v869_v60 = vmul.f32 %v866_v32, %v853_v29 }
 0x172   :  { %v366_v19 = vadd.f32 %v363_v16, %v341_v51  ;;  %v367_v11 = vadd.f32 %v364_v55, %v342_v28  ;;  %v365_v22 = vadd.f32 %v362_v26, %v340_v0  ;;  %v848_v17 = vadd.f32 %v845_v6, %v824_v34 }
 0x173   :  { %v373_v36 = vpop.permute.xlu0 %372  ;;  %v877_v56 = vpop.permute.xlu1 %876  ;;  %v871_v16 = vadd.f32 %v868_v2, %v847_v35 }
 0x174   :  { %v388_v37 = vmul.f32 %v382_v8, %v373_v36  ;;  %v389_v61 = vmul.f32 %v386_v41, %v373_v36  ;;  %v387_v25 = vmul.f32 %v378_v42, %v373_v36  ;;  %v846_v8 = vadd.f32 %v843_v50, %v822_v7 }
 0x175   :  { %v891_v4 = vmul.f32 %v882_v20, %v877_v56  ;;  %v892_v29 = vmul.f32 %v886_v5, %v877_v56  ;;  %v893_v18 = vmul.f32 %v890_v9, %v877_v56  ;;  %v914_v20 = vrot.slane %v1305_v57, %v1325_v14 }
 0x176   :  { %v391_v38 = vadd.f32 %v388_v37, %v366_v19  ;;  %v392_v49 = vadd.f32 %v389_v61, %v367_v11  ;;  %v390_v3 = vadd.f32 %v387_v25, %v365_v22  ;;  %v872_v55 = vadd.f32 %v869_v60, %v848_v17 }
 0x177   :  { %v398_v47 = vpop.permute.xlu0 %397  ;;  %v901_v58 = vpop.permute.xlu1 %900  ;;  %v895_v56 = vadd.f32 %v892_v29, %v871_v16 }
 0x178   :  { %v413_v23 = vmul.f32 %v407_v48, %v398_v47  ;;  %v414_v43 = vmul.f32 %v411_v39, %v398_v47  ;;  %v412_v44 = vmul.f32 %v403_v45, %v398_v47  ;;  %v457_v45 = vrot.slane %v1313_v63, %v1325_v14 }
 0x179   :  { %v870_v48 = vadd.f32 %v867_v33, %v846_v8  ;;  %v915_v24 = vmul.f32 %v906_v12, %v901_v58  ;;  %v910_v63 = vrot.slane %v1329_v1, %v1325_v14  ;;  %v896_v26 = vadd.f32 %v893_v18, %v872_v55 }
 0x17a   :  { %v416_v42 = vadd.f32 %v413_v23, %v391_v38  ;;  %v417_v59 = vadd.f32 %v414_v43, %v392_v49  ;;  %v415_v36 = vadd.f32 %v412_v44, %v390_v3 }
 0x17b   :  { %v423_v30 = vpop.permute.xlu0 %422  ;;  %v894_v12 = vadd.f32 %v891_v4, %v870_v48  ;;  %v925_v9 = vpop.permute.xlu1 %924 }
 0x17c   :  { %v438_v41 = vmul.f32 %v432_v54, %v423_v30  ;;  %v439_v21 = vmul.f32 %v436_v27, %v423_v30  ;;  %v437_v39 = vmul.f32 %v428_v46, %v423_v30  ;;  %v916_v54 = vmul.f32 %v910_v63, %v901_v58 }
 0x17d   :  { %v918_v5 = vadd.f32 %v915_v24, %v894_v12 }
 0x17e   :  { %v441_v27 = vadd.f32 %v438_v41, %v416_v42  ;;  %v442_v50 = vadd.f32 %v439_v21, %v417_v59  ;;  %v440_v46 = vadd.f32 %v437_v39, %v415_v36  ;;  %v919_v57 = vadd.f32 %v916_v54, %v895_v56 }
 0x17f   :  { %v448_v40 = vpop.permute.xlu0 %447  ;;  %v927_v1 = vadd.f32 %v925_v9, %v918_v5 }
 0x180   :  { %v462_v53 = vmul.f32 %v453_v62, %v448_v40  ;;  %v463_v31 = vmul.f32 %v457_v45, %v448_v40  ;;  %v464_v32 = vmul.f32 %v461_v13, %v448_v40  ;;  %v917_v13 = vmul.f32 %v914_v20, %v901_v58 }
 0x181   :  { %v928_v47 = vadd.f32 %v925_v9, %v919_v57 }
 0x182   :  { %v466_v15 = vadd.f32 %v463_v31, %v441_v27  ;;  %v467_v6 = vadd.f32 %v464_v32, %v442_v50  ;;  %v465_v7 = vadd.f32 %v462_v53, %v440_v46  ;;  %v920_v14 = vadd.f32 %v917_v13, %v896_v26 }
 0x183   :  { %v472_v62 = vpop.permute.xlu0 %471 }
 0x184   :  { %v475_v51 = vadd.f32 %v472_v62, %v466_v15  ;;  %v476_v10 = vadd.f32 %v472_v62, %v467_v6  ;;  %v474_v37 = vadd.f32 %v472_v62, %v465_v7  ;;  %v929_v52 = vadd.f32 %v925_v9, %v920_v14 }
 0x186   :  { %484 = vrot.lane.b32.xlu0 %v476_v10, %s1043_s3  ;;  %482 = vrot.lane.b32.xlu1 %v475_v51, %s1043_s3 }
 0x18a   :  { %933 = vrot.lane.b32.xlu1 %v927_v1, %s1043_s3  ;;  %480 = vrot.lane.b32.xlu0 %v474_v37, %s1043_s3 }
 0x18e   :  { %937 = vrot.lane.b32.xlu1 %v929_v52, %s1043_s3  ;;  %935 = vrot.lane.b32.xlu0 %v928_v47, %s1043_s3 }
 0x1f8   :  { %v485_v34 = vpop.permute.xlu0 %484  ;;  %v483_v28 = vpop.permute.xlu1 %482 }
 0x1f9   :  { %v488_v61 = vsel %vm486_vm8, %v483_v28, %v485_v34  ;;  %495 = vst.msk [vmem:[#allocation2 + $0x10] sm:$0xff] %vm494_vm9, %v485_v34 }
 0x1fa   :  { %493 = vst [vmem:[#allocation2 + $0x8] sm:$0xff] %v488_v61 }
 0x1fc   :  { %v934_v0 = vpop.permute.xlu1 %933  ;;  %v481_v19 = vpop.permute.xlu0 %480 }
 0x1fd   :  { %v487_v25 = vsel %vm486_vm8, %v481_v19, %v483_v28 }
 0x1fe   :  { %492 = vst [vmem:[#allocation2] sm:$0xff] %v487_v25 }
 0x200   :  { %v938_v23 = vpop.permute.xlu1 %937  ;;  %v936_v11 = vpop.permute.xlu0 %935 }
 0x201   :  { %947 = vst.msk [vmem:[#allocation2 + $0x28] sm:$0xff] %vm494_vm9, %v938_v23  ;;  %v939_v33 = vsel %vm486_vm8, %v934_v0, %v936_v11  ;;  %v940_v2 = vsel %vm486_vm8, %v936_v11, %v938_v23 }
 0x202   :  { %945 = vst [vmem:[#allocation2 + $0x18] sm:$0xff] %v939_v33  ;;  %946 = vst [vmem:[#allocation2 + $0x20] sm:$0xff] %v940_v2 }
 0x203   :  { %1023 = shalt.err (!%p1020_p4)
}
 0x204   :  { %s1045_s23 = smov 384   ;;  %s1046_s24 = smov 24  }
 0x205   :  { %959 = dma.vmem_to_hbm [thread:$0]  %s954_s21, 768, %s1455_s5, [#allocation3], %s1045_s23, %s1045_s23, %s1046_s24  }
 0x206   :  { %1032 = dma.done.wait [#allocation3], 768  }
 0x207   :  { %1033 = vsyncadd [#allocation3], 4294966528 }
 0x208   :  { %963 = vsyncpa [#allocation3], 1 }

</bundles_post_ra>
